<compile_context>
chip_gen: v5e
topology: v5e:2x2
jax: 0.10.0
libtpu: 0.0.40
codegen_flags: <defaults>
</compile_context>

<pallas_src>
import numpy as np
import jax
import jax.numpy as jnp
from jax.experimental import pallas as pl
from jax.experimental.pallas import tpu as pltpu


def _round_up(x, m):
    return ((x + m - 1) // m) * m


def _tensorcores_per_chip():
    """Best-effort TensorCores-per-chip: v5e/v6e = 1, v7x (and megacore v4/v5p) = 2."""
    devs = jax.devices()
    kind = (devs[0].device_kind or "").lower() if devs else ""
    if "lite" in kind or "v5e" in kind or "v6" in kind:
        return 1
    if "v7" in kind or "tpu7" in kind or "v4" in kind or "v5p" in kind:
        return 2
    return 1


def _vmem_working_set_bytes(tb, d_in, n1, n2):
    """Rough per-grid-step VMEM working-set estimate (bytes) for the fused kernel."""
    lane = 128
    x_tiles = 2 * tb * d_in * 4                    # double-buffered f32 x tile
    x_bf16 = tb * d_in * 2                         # in-kernel bf16 copy of the x tile
    h1 = tb * n1 * 4                               # f32 activations
    h2 = tb * n2 * 4
    out_tiles = 2 * tb * lane * 4                  # (tb,1) blocks pad to 128 lanes
    weights = 2 * (d_in * n1 * 2 + n1 * n2 * 2) + (n1 + n2 + n2 + 1) * 4
    return x_tiles + x_bf16 + h1 + h2 + out_tiles + weights


_VMEM_TILE_BUDGET = 24 * 1024 * 1024        # keep working set well under v7x's 64 MiB VMEM
_VMEM_RAISE_LIMIT_ABOVE = 12 * 1024 * 1024  # v5e's default scoped VMEM is only 16 MiB
_VMEM_LIMIT_BYTES = 48 * 1024 * 1024        # explicit limit when the estimate is large


def _choose_batch_tile(B, batch_tile, d_in, n1, n2):
    """Batch-tile selection: large tile (amortize per-step overhead), multiple of 8,
    >=2 tiles on multi-TC parts when each half still fills the MXU, VMEM-budget capped."""
    batch_tile = _round_up(max(int(batch_tile), 8), 8)
    tb = min(batch_tile, _round_up(B, 8))
    # Multi-TC (v7x): make sure the "parallel" batch axis has >= 2 tiles so the second
    # TensorCore gets work -- but only when each half still has >= 128 rows.  On
    # single-TC v5e/v6e this cap would just double the number of grid steps.
    if _tensorcores_per_chip() >= 2 and B >= 256:
        tb = min(tb, _round_up(pl.cdiv(B, 2), 8))
    # Cap the tile so the double-buffered working set stays within a conservative
    # VMEM budget (keeps a tile that compiles on v6e from blowing past v5e/v7x limits).
    while tb > 8 and _vmem_working_set_bytes(tb, d_in, n1, n2) > _VMEM_TILE_BUDGET:
        tb = max(8, _round_up(tb // 2, 8))
    return tb


# ----------------------------- Pallas kernel --------------------------------
def _mlp_kernel(x_ref, w1_ref, b1_ref, w2_ref, b2_ref, w3_ref, b3_ref, o_ref):
    """Fused 3-layer MLP on one batch tile.

    x_ref : (TB, D_IN)  VMEM f32   (cast to bf16 in-kernel; VPU filler under the DMA)
    w1_ref: (D_IN, H1)  VMEM bf16  b1_ref: (1, H1) VMEM f32
    w2_ref: (H1, H2)    VMEM bf16  b2_ref: (1, H2) VMEM f32
    w3_ref: (1, H2)     VMEM f32   b3_ref: (1,)    SMEM f32
    o_ref : (TB, 1)     VMEM f32
    """
    # Dropout(0.5) -> identity in eval mode.
    x = x_ref[...].astype(jnp.bfloat16)

    # Layer 1: bf16 MXU matmul, f32 accumulation; bias add + LeakyReLU(0.1) in f32 (VPU).
    h1 = jnp.dot(x, w1_ref[...], preferred_element_type=jnp.float32) + b1_ref[...]
    h1 = jnp.where(h1 > 0, h1, 0.1 * h1)

    # Dropout(0.2) -> identity in eval mode.
    # Layer 2: cast activations to bf16 only for the MXU; keep math in f32.
    h2 = jnp.dot(h1.astype(jnp.bfloat16), w2_ref[...],
                 preferred_element_type=jnp.float32) + b2_ref[...]
    h2 = jnp.tanh(h2)                                                    # EUP, f32

    # Layer 3 (N=1): VPU multiply + lane reduction (XLU) instead of a 1-column matmul.
    out = jnp.sum(h2 * w3_ref[...], axis=-1, keepdims=True) + b3_ref[0]  # (TB, 1)

    # (TB, 1) writeback: 4 B/row of HBM instead of a 128-lane broadcast slab.
    o_ref[...] = out.astype(o_ref.dtype)


def regressor_fc_forward(x_nchw, params, *, batch_tile=1024):
    """Runs the Regressor_fc forward pass via a fused Pallas kernel.

    x_nchw: (B, C, H, W) float32 (PyTorch NCHW layout).
    params: dict with w1 (D_IN,H1), b1 (H1,), w2 (H1,H2), b2 (H2,), w3 (H2,1), b3 (1,)
    Returns: (B, 1) float32
    """
    B = x_nchw.shape[0]
    x2d = x_nchw.reshape(B, -1)                    # flatten(1), row-major like PyTorch
    if x2d.dtype != jnp.float32:
        x2d = x2d.astype(jnp.float32)
    d_in = x2d.shape[1]

    # Parameters: MXU weights in bf16 (one-time cast, halves weight HBM->VMEM bytes);
    # biases and the final (VPU) weight row stay in f32.
    w1 = params["w1"].astype(jnp.bfloat16)
    w2 = params["w2"].astype(jnp.bfloat16)
    b1 = params["b1"].reshape(1, -1).astype(jnp.float32)
    b2 = params["b2"].reshape(1, -1).astype(jnp.float32)
    w3_row = params["w3"].reshape(1, -1).astype(jnp.float32)   # (1, H2)
    b3 = params["b3"].reshape(1).astype(jnp.float32)           # (1,) -> SMEM scalar
    n1 = w1.shape[1]
    n2 = w2.shape[1]

    tb = _choose_batch_tile(B, batch_tile, d_in, n1, n2)
    num_tiles = pl.cdiv(B, tb)     # ragged last tile handled by Pallas OOB masking

    est = _vmem_working_set_bytes(tb, d_in, n1, n2)
    vmem_limit = _VMEM_LIMIT_BYTES if est > _VMEM_RAISE_LIMIT_ABOVE else None

    cost = pl.CostEstimate(
        flops=int(2 * B * (d_in * n1 + n1 * n2 + n2)),
        transcendentals=int(B * n2),
        bytes_accessed=int(x2d.size * 4 + w1.size * 2 + w2.size * 2
                           + (b1.size + b2.size + w3_row.size + b3.size) * 4
                           + B * 4),
    )

    grid_spec = pltpu.PrefetchScalarGridSpec(
        num_scalar_prefetch=0,
        grid=(num_tiles,),
        in_specs=[
            pl.BlockSpec((tb, d_in), lambda i: (i, 0)),          # x batch tile (f32)
            pl.BlockSpec((d_in, n1), lambda i: (0, 0)),          # W1 (resident, bf16)
            pl.BlockSpec((1, n1),    lambda i: (0, 0)),          # b1
            pl.BlockSpec((n1, n2),   lambda i: (0, 0)),          # W2 (resident, bf16)
            pl.BlockSpec((1, n2),    lambda i: (0, 0)),          # b2
            pl.BlockSpec((1, n2),    lambda i: (0, 0)),          # W3 row (f32)
            pl.BlockSpec(memory_space=pltpu.MemorySpace.SMEM),   # b3 scalar
        ],
        out_specs=pl.BlockSpec((tb, 1), lambda i: (i, 0)),
    )
    return pl.pallas_call(
        _mlp_kernel,
        out_shape=jax.ShapeDtypeStruct((B, 1), jnp.float32),
        grid_spec=grid_spec,
        compiler_params=pltpu.CompilerParams(
            dimension_semantics=("parallel",),
            vmem_limit_bytes=vmem_limit,
        ),
        cost_estimate=cost,
    )(x2d, w1, b1, w2, b2, w3_row, b3)


# ------------------------- deterministic parameters --------------------------
def init_params(key, d_in, h1, h2):
    """PyTorch-style default Linear init: U(-1/sqrt(fan_in), 1/sqrt(fan_in))."""
    ks = jax.random.split(key, 6)

    def lin(kw, kb, fan_in, fan_out):
        bound = 1.0 / np.sqrt(fan_in)
        w = jax.random.uniform(kw, (fan_in, fan_out), jnp.float32, -bound, bound)
        b = jax.random.uniform(kb, (fan_out,), jnp.float32, -bound, bound)
        return w, b

    w1, b1 = lin(ks[0], ks[1], d_in, h1)
    w2, b2 = lin(ks[2], ks[3], h1, h2)
    w3, b3 = lin(ks[4], ks[5], h2, 1)
    return {"w1": w1, "b1": b1, "w2": w2, "b2": b2, "w3": w3, "b3": b3}


# ------------------------------ references -----------------------------------
def reference_forward_f32(x_nchw, params):
    """Plain-JAX f32 reference (eval-mode dropout = identity)."""
    x = x_nchw.reshape(x_nchw.shape[0], -1)
    h1 = x @ params["w1"] + params["b1"]
    h1 = jnp.where(h1 > 0, h1, 0.1 * h1)
    h2 = jnp.tanh(h1 @ params["w2"] + params["b2"])
    return h2 @ params["w3"] + params["b3"]


def reference_forward_bf16(x_nchw, params):
    """Plain-JAX reference mirroring the kernel's bf16-matmul / f32-accumulate scheme."""
    x = x_nchw.reshape(x_nchw.shape[0], -1).astype(jnp.bfloat16)
    w1 = params["w1"].astype(jnp.bfloat16)
    w2 = params["w2"].astype(jnp.bfloat16)
    h1 = jnp.dot(x, w1, preferred_element_type=jnp.float32) + params["b1"]
    h1 = jnp.where(h1 > 0, h1, 0.1 * h1)
    h2 = jnp.tanh(jnp.dot(h1.astype(jnp.bfloat16), w2,
                          preferred_element_type=jnp.float32) + params["b2"])
    return jnp.sum(h2 * params["w3"].T, axis=-1, keepdims=True) + params["b3"]


# ----------------------------------- main ------------------------------------
if __name__ == "__main__":
    key = jax.random.PRNGKey(0)
    k_x, k_p = jax.random.split(key)

    # Small shapes consistent with the module: NCHW input flattened to D_IN.
    B, C, H, W = 8, 2, 16, 16        # D_IN = 512
    D_IN = C * H * W
    H1, H2 = 256, 128                # shrunk hidden sizes (orig: 10000, 6000)

    x = jax.random.normal(k_x, (B, C, H, W), dtype=jnp.float32)
    params = init_params(k_p, D_IN, H1, H2)

    out = regressor_fc_forward(x, params)
    out = jax.block_until_ready(out)
    assert out.shape == (B, 1)

    # Tight check vs. a reference using the same bf16-matmul / f32-accumulate scheme,
    # loose check vs. the pure-f32 reference (bf16 rounding of inputs).
    ref_bf16 = reference_forward_bf16(x, params)
    ref_f32 = reference_forward_f32(x, params)
    np.testing.assert_allclose(np.asarray(out), np.asarray(ref_bf16), rtol=2e-3, atol=2e-3)
    np.testing.assert_allclose(np.asarray(out), np.asarray(ref_f32), rtol=5e-2, atol=5e-2)

    print("KERNEL_OK")
</pallas_src>

<mosaic_0001>
module attributes {stable_mosaic.version = 11 : i64} {
  func.func @_mlp_kernel(%arg0: i32, %arg1: memref<8x512xf32, #tpu.memory_space<vmem>>, %arg2: memref<512x256xbf16, #tpu.memory_space<vmem>>, %arg3: memref<1x256xf32, #tpu.memory_space<vmem>>, %arg4: memref<256x128xbf16, #tpu.memory_space<vmem>>, %arg5: memref<1x128xf32, #tpu.memory_space<vmem>>, %arg6: memref<1x128xf32, #tpu.memory_space<vmem>>, %arg7: memref<1xf32, #tpu.memory_space<smem>>, %arg8: memref<8x1xf32, #tpu.memory_space<vmem>>) attributes {dimension_semantics = [#tpu.dimension_semantics<parallel>], iteration_bounds = array<i64: 1>, scalar_prefetch = 0 : i64, scratch_operands = 0 : i64, tpu.core_type = #tpu.core_type<tc>, window_params = [{transform_indices = @transform_0, window_bounds = array<i64: 8, 512>}, {pipeline_mode = #tpu.pipeline_mode<synchronous>, transform_indices = @transform_1, window_bounds = array<i64: 512, 256>}, {pipeline_mode = #tpu.pipeline_mode<synchronous>, transform_indices = @transform_2, window_bounds = array<i64: 1, 256>}, {pipeline_mode = #tpu.pipeline_mode<synchronous>, transform_indices = @transform_3, window_bounds = array<i64: 256, 128>}, {pipeline_mode = #tpu.pipeline_mode<synchronous>, transform_indices = @transform_4, window_bounds = array<i64: 1, 128>}, {pipeline_mode = #tpu.pipeline_mode<synchronous>, transform_indices = @transform_5, window_bounds = array<i64: 1, 128>}, {transform_indices = @transform_6, window_bounds = array<i64: 1>}, {transform_indices = @transform_7, window_bounds = array<i64: 8, 1>}]} {
    %c0 = arith.constant 0 : index
    %c0_0 = arith.constant 0 : index
    %0 = vector.load %arg1[%c0, %c0_0] : memref<8x512xf32, #tpu.memory_space<vmem>>, vector<8x512xf32>
    %1 = arith.truncf %0 : vector<8x512xf32> to vector<8x512xbf16>
    %c0_1 = arith.constant 0 : index
    %c0_2 = arith.constant 0 : index
    %2 = vector.load %arg2[%c0_1, %c0_2] : memref<512x256xbf16, #tpu.memory_space<vmem>>, vector<512x256xbf16>
    %cst = arith.constant dense<0.000000e+00> : vector<8x256xf32>
    %3 = tpu.matmul %1, %2, %cst {dimension_numbers = #tpu.dot_dimension_numbers<[1], [0], [0], [1], [0, 0, 1, 1], [], []>} : vector<8x512xbf16>, vector<512x256xbf16>, vector<8x256xf32> -> vector<8x256xf32>
    %c0_3 = arith.constant 0 : index
    %c0_4 = arith.constant 0 : index
    %4 = vector.load %arg3[%c0_3, %c0_4] : memref<1x256xf32, #tpu.memory_space<vmem>>, vector<1x256xf32>
    %5 = vector.broadcast %4 : vector<1x256xf32> to vector<8x256xf32>
    %6 = arith.addf %3, %5 : vector<8x256xf32>
    %cst_5 = arith.constant 0.000000e+00 : f32
    %7 = vector.broadcast %cst_5 : f32 to vector<8x256xf32>
    %8 = arith.cmpf ogt, %6, %7 : vector<8x256xf32>
    %cst_6 = arith.constant 1.000000e-01 : f32
    %9 = vector.broadcast %cst_6 : f32 to vector<8x256xf32>
    %10 = arith.mulf %9, %6 : vector<8x256xf32>
    %11 = arith.select %8, %6, %10 : vector<8x256xi1>, vector<8x256xf32>
    %12 = arith.truncf %11 : vector<8x256xf32> to vector<8x256xbf16>
    %c0_7 = arith.constant 0 : index
    %c0_8 = arith.constant 0 : index
    %13 = vector.load %arg4[%c0_7, %c0_8] : memref<256x128xbf16, #tpu.memory_space<vmem>>, vector<256x128xbf16>
    %cst_9 = arith.constant dense<0.000000e+00> : vector<8x128xf32>
    %14 = tpu.matmul %12, %13, %cst_9 {dimension_numbers = #tpu.dot_dimension_numbers<[1], [0], [0], [1], [0, 0, 1, 1], [], []>} : vector<8x256xbf16>, vector<256x128xbf16>, vector<8x128xf32> -> vector<8x128xf32>
    %c0_10 = arith.constant 0 : index
    %c0_11 = arith.constant 0 : index
    %15 = vector.load %arg5[%c0_10, %c0_11] : memref<1x128xf32, #tpu.memory_space<vmem>>, vector<1x128xf32>
    %16 = vector.broadcast %15 : vector<1x128xf32> to vector<8x128xf32>
    %17 = arith.addf %14, %16 : vector<8x128xf32>
    %18 = math.tanh %17 : vector<8x128xf32>
    %c0_12 = arith.constant 0 : index
    %c0_13 = arith.constant 0 : index
    %19 = vector.load %arg6[%c0_12, %c0_13] : memref<1x128xf32, #tpu.memory_space<vmem>>, vector<1x128xf32>
    %20 = vector.broadcast %19 : vector<1x128xf32> to vector<8x128xf32>
    %21 = arith.mulf %18, %20 : vector<8x128xf32>
    %cst_14 = arith.constant dense<0.000000e+00> : vector<8xf32>
    %22 = vector.multi_reduction <add>, %21, %cst_14 [1] : vector<8x128xf32> to vector<8xf32>
    %23 = vector.shape_cast %22 : vector<8xf32> to vector<8x1xf32>
    %c0_15 = arith.constant 0 : index
    %24 = memref.load %arg7[%c0_15] : memref<1xf32, #tpu.memory_space<smem>>
    %25 = vector.broadcast %24 : f32 to vector<8x1xf32>
    %26 = arith.addf %23, %25 : vector<8x1xf32>
    %c0_16 = arith.constant 0 : index
    %c0_17 = arith.constant 0 : index
    %27 = vector.load %arg8[%c0_16, %c0_17] : memref<8x1xf32, #tpu.memory_space<vmem>>, vector<8x1xf32>
    tpu.vector_store %arg8[%c0_16, %c0_17], %26 {strides = array<i32>} : memref<8x1xf32, #tpu.memory_space<vmem>>, vector<8x1xf32>,
    return
  }
  func.func @transform_0(%arg0: i32) -> (i32, i32) {
    %c0_i32 = arith.constant 0 : i32
    %c0_i32_0 = arith.constant 0 : i32
    return %arg0, %c0_i32 : i32, i32
  }
  func.func @transform_1(%arg0: i32) -> (i32, i32) {
    %c0_i32 = arith.constant 0 : i32
    %c0_i32_0 = arith.constant 0 : i32
    %c0_i32_1 = arith.constant 0 : i32
    return %c0_i32, %c0_i32_0 : i32, i32
  }
  func.func @transform_2(%arg0: i32) -> (i32, i32) {
    %c0_i32 = arith.constant 0 : i32
    %c0_i32_0 = arith.constant 0 : i32
    %c0_i32_1 = arith.constant 0 : i32
    return %c0_i32, %c0_i32_0 : i32, i32
  }
  func.func @transform_3(%arg0: i32) -> (i32, i32) {
    %c0_i32 = arith.constant 0 : i32
    %c0_i32_0 = arith.constant 0 : i32
    %c0_i32_1 = arith.constant 0 : i32
    return %c0_i32, %c0_i32_0 : i32, i32
  }
  func.func @transform_4(%arg0: i32) -> (i32, i32) {
    %c0_i32 = arith.constant 0 : i32
    %c0_i32_0 = arith.constant 0 : i32
    %c0_i32_1 = arith.constant 0 : i32
    return %c0_i32, %c0_i32_0 : i32, i32
  }
  func.func @transform_5(%arg0: i32) -> (i32, i32) {
    %c0_i32 = arith.constant 0 : i32
    %c0_i32_0 = arith.constant 0 : i32
    %c0_i32_1 = arith.constant 0 : i32
    return %c0_i32, %c0_i32_0 : i32, i32
  }
  func.func @transform_6(%arg0: i32) -> i32 {
    %c0_i32 = arith.constant 0 : i32
    %c0_i32_0 = arith.constant 0 : i32
    return %c0_i32 : i32
  }
  func.func @transform_7(%arg0: i32) -> (i32, i32) {
    %c0_i32 = arith.constant 0 : i32
    %c0_i32_0 = arith.constant 0 : i32
    return %arg0, %c0_i32 : i32, i32
  }
}

</mosaic_0001>

<bundles_post_ra>
// kernel: tpu_custom_call.1
= control target key start
LH: loop header
LB: loop body
LE: loop exit
PB: predicated region body
PF: predicated region fallthrough
CT: control target
= control target key end

     0   :  { %13 = vsyncpa [#allocation4], 0  ;;  %s1333_s0 = inlined_call_operand.hbm [shape: f32[8,512], index: 0, kind: input, shape index: {}]   ;;  %s1334_s1 = inlined_call_operand.hbm [shape: bf16[512,256], index: 1, kind: input, shape index: {}]   ;;  %s1335_s2 = inlined_call_operand.vmem [shape: f32[1,256], index: 2, kind: input, shape index: {}]   ;;  %s1336_s3 = inlined_call_operand.hbm [shape: bf16[256,128], index: 3, kind: input, shape index: {}]   ;;  %s1337_s4 = inlined_call_operand.vmem [shape: f32[1,128], index: 4, kind: input, shape index: {}]   ;;  %s1338_s5 = inlined_call_operand.vmem [shape: f32[1,128], index: 5, kind: input, shape index: {}]   ;;  %s1339_s6 = inlined_call_operand.<no memory space> [shape: f32[1], index: 6, kind: input, shape index: {}]   ;;  %s1340_s7 = inlined_call_operand.vmem [shape: f32[8,1], index: 7, kind: output, shape index: {}]  }
   0x1   :  { %14 = vsyncpa [#allocation6], 0  ;;  %s30_s26 = sshll.u32 %s1334_s1, 4  ;;  %s1246_s27 = smov [#allocation5]   ;;  %s31_s26 = int_to_ptr.hbm [resolvable:$true] %s30_s26 }
   0x2   :  { %s32_s28 = sshll.u32 %s1246_s27, 4  ;;  %s20_s8 = sshll.u32 %s1333_s0, 4  ;;  %s33_s28 = int_to_ptr.vmem [resolvable:$true] %s32_s28  ;;  %s21_s8 = int_to_ptr.hbm [resolvable:$true] %s20_s8 }
   0x3   :  { %s1247_s9 = smov 128   ;;  %s1248_s10 = smov 8  }
   0x4   :  { %38 = dma.hbm_to_vmem [thread:$0]  %s31_s26, 8192, %s33_s28, [#allocation6], %s1247_s9, %s1247_s9, %s1248_s10  }
   0x5   :  { %s1249_s11 = smov [#allocation3]   ;;  %s45_s15 = sshll.u32 %s1336_s3, 4  ;;  %s46_s15 = int_to_ptr.hbm [resolvable:$true] %s45_s15 }
   0x6   :  { %s22_s12 = sshll.u32 %s1249_s11, 4  ;;  %s1250_s1 = smov [#allocation7]   ;;  %s23_s12 = int_to_ptr.vmem [resolvable:$true] %s22_s12 }
   0x7   :  { %25 = dma.hbm_to_vmem [thread:$0]  %s21_s8, 512, %s23_s12, [#allocation4]  }
   0x8   :  { %s47_s16 = sshll.u32 %s1250_s1, 4  ;;  %s1251_s17 = smov 64   ;;  %s48_s16 = int_to_ptr.vmem [resolvable:$true] %s47_s16 }
   0x9   :  { %s1252_s18 = smov 4  }
   0xa   :  { %53 = dma.hbm_to_vmem [thread:$0]  %s46_s15, 2048, %s48_s16, [#allocation6], %s1251_s17, %s1251_s17, %s1252_s18  }
   0xb   :  { %1242 = dma.done.wait [#allocation4], 512  }
   0xc   :  { %1243 = vsyncadd [#allocation4], 4294966784 }
   0xd   :  { %1244 = dma.done.wait [#allocation6], 10240  }
   0xe   :  { %1245 = vsyncadd [#allocation6], 4294957056  ;;  %v817_v0 = vld [vmem:[#allocation5 + $0x70] sm:$0xf]  ;;  %v1094_v1 = vld [vmem:[#allocation5 + $0x74] sm:$0xf0] }
   0xf   :  { %v881_v2 = vld [vmem:[#allocation5 + $0xf0] sm:$0xf]  ;;  %v818_v3 = vor.u32 %v1094_v1, %v817_v0  ;;  %v1110_v4 = vld [vmem:[#allocation5 + $0xf4] sm:$0xf0]  ;;  %v809_v11 = vld [vmem:[#allocation5 + $0x60] sm:$0xf] }
  0x10   :  { %v945_v5 = vld [vmem:[#allocation5 + $0x170] sm:$0xf]  ;;  %v1126_v6 = vld [vmem:[#allocation5 + $0x174] sm:$0xf0]  ;;  %v882_v7 = vor.u32 %v1110_v4, %v881_v2  ;;  %v1092_v13 = vld [vmem:[#allocation5 + $0x64] sm:$0xf0] }
  0x11   :  { %v946_v8 = vor.u32 %v1126_v6, %v945_v5  ;;  %v1009_v9 = vld [vmem:[#allocation5 + $0x1f0] sm:$0xf]  ;;  %v1142_v10 = vld [vmem:[#allocation5 + $0x1f4] sm:$0xf0]  ;;  %470 = vmatpush.bf16.msra.mxu0 %v818_v3  ;;  %v873_v14 = vld [vmem:[#allocation5 + $0xe0] sm:$0xf]  ;;  %v810_v16 = vor.u32 %v1092_v13, %v809_v11 }
  0x12   :  { %v1010_v12 = vor.u32 %v1142_v10, %v1009_v9  ;;  %v1108_v15 = vld [vmem:[#allocation5 + $0xe4] sm:$0xf0]  ;;  %483 = vmatpush.bf16.msra.mxu1 %v882_v7  ;;  %v937_v18 = vld [vmem:[#allocation5 + $0x160] sm:$0xf]  ;;  %v801_v23 = vld [vmem:[#allocation5 + $0x50] sm:$0xf] }
  0x13   :  { %496 = vmatpush.bf16.msra.mxu2 %v946_v8  ;;  %v874_v17 = vor.u32 %v1108_v15, %v873_v14  ;;  %v1124_v19 = vld [vmem:[#allocation5 + $0x164] sm:$0xf0]  ;;  %v1001_v20 = vld [vmem:[#allocation5 + $0x1e0] sm:$0xf]  ;;  %v1090_v24 = vld [vmem:[#allocation5 + $0x54] sm:$0xf0] }
  0x14   :  { %509 = vmatpush.bf16.msra.mxu3 %v1010_v12  ;;  %v938_v21 = vor.u32 %v1124_v19, %v937_v18  ;;  %v1140_v22 = vld [vmem:[#allocation5 + $0x1e4] sm:$0xf0]  ;;  %v865_v26 = vld [vmem:[#allocation5 + $0xd0] sm:$0xf]  ;;  %v1106_v27 = vld [vmem:[#allocation5 + $0xd4] sm:$0xf0]  ;;  %v802_v29 = vor.u32 %v1090_v24, %v801_v23 }
  0x15   :  { %v1002_v25 = vor.u32 %v1140_v22, %v1001_v20  ;;  %v929_v28 = vld [vmem:[#allocation5 + $0x150] sm:$0xf]  ;;  %471 = vmatpush.bf16.msra.mxu0 %v810_v16  ;;  %v1122_v30 = vld [vmem:[#allocation5 + $0x154] sm:$0xf0]  ;;  %v866_v33 = vor.u32 %v1106_v27, %v865_v26  ;;  %v793_v35 = vld [vmem:[#allocation5 + $0x40] sm:$0xf] }
  0x16   :  { %v993_v31 = vld [vmem:[#allocation5 + $0x1d0] sm:$0xf]  ;;  %v1138_v32 = vld [vmem:[#allocation5 + $0x1d4] sm:$0xf0]  ;;  %484 = vmatpush.bf16.msra.mxu1 %v874_v17  ;;  %v930_v34 = vor.u32 %v1122_v30, %v929_v28  ;;  %v1088_v36 = vld [vmem:[#allocation5 + $0x44] sm:$0xf0] }
  0x17   :  { %497 = vmatpush.bf16.msra.mxu2 %v938_v21  ;;  %v857_v37 = vld [vmem:[#allocation5 + $0xc0] sm:$0xf]  ;;  %v994_v38 = vor.u32 %v1138_v32, %v993_v31  ;;  %v1104_v39 = vld [vmem:[#allocation5 + $0xc4] sm:$0xf0]  ;;  %v794_v44 = vor.u32 %v1088_v36, %v793_v35  ;;  %v785_v47 = vld [vmem:[#allocation5 + $0x30] sm:$0xf] }
  0x18   :  { %510 = vmatpush.bf16.msra.mxu3 %v1002_v25  ;;  %v921_v40 = vld [vmem:[#allocation5 + $0x140] sm:$0xf]  ;;  %v1120_v41 = vld [vmem:[#allocation5 + $0x144] sm:$0xf0]  ;;  %v858_v45 = vor.u32 %v1104_v39, %v857_v37  ;;  %v1086_v48 = vld [vmem:[#allocation5 + $0x34] sm:$0xf0] }
  0x19   :  { %v985_v42 = vld [vmem:[#allocation5 + $0x1c0] sm:$0xf]  ;;  %v1136_v43 = vld [vmem:[#allocation5 + $0x1c4] sm:$0xf0]  ;;  %472 = vmatpush.bf16.msra.mxu0 %v802_v29  ;;  %v922_v46 = vor.u32 %v1120_v41, %v921_v40  ;;  %v849_v49 = vld [vmem:[#allocation5 + $0xb0] sm:$0xf]  ;;  %v786_v56 = vor.u32 %v1086_v48, %v785_v47 }
  0x1a   :  { %485 = vmatpush.bf16.msra.mxu1 %v866_v33  ;;  %v986_v50 = vor.u32 %v1136_v43, %v985_v42  ;;  %v1102_v51 = vld [vmem:[#allocation5 + $0xb4] sm:$0xf0]  ;;  %v913_v52 = vld [vmem:[#allocation5 + $0x130] sm:$0xf]  ;;  %v777_v59 = vld [vmem:[#allocation5 + $0x20] sm:$0xf] }
  0x1b   :  { %498 = vmatpush.bf16.msra.mxu2 %v930_v34  ;;  %v1118_v53 = vld [vmem:[#allocation5 + $0x134] sm:$0xf0]  ;;  %v977_v54 = vld [vmem:[#allocation5 + $0x1b0] sm:$0xf]  ;;  %v850_v57 = vor.u32 %v1102_v51, %v849_v49  ;;  %v1084_v60 = vld [vmem:[#allocation5 + $0x24] sm:$0xf0] }
  0x1c   :  { %511 = vmatpush.bf16.msra.mxu3 %v994_v38  ;;  %v1134_v55 = vld [vmem:[#allocation5 + $0x1b4] sm:$0xf0]  ;;  %v914_v58 = vor.u32 %v1118_v53, %v913_v52  ;;  %v841_v61 = vld [vmem:[#allocation5 + $0xa0] sm:$0xf]  ;;  %v1100_v63 = vld [vmem:[#allocation5 + $0xa4] sm:$0xf0]  ;;  %v778_v4 = vor.u32 %v1084_v60, %v777_v59 }
  0x1d   :  { %473 = vmatpush.bf16.msra.mxu0 %v794_v44  ;;  %v978_v62 = vor.u32 %v1134_v55, %v977_v54  ;;  %v905_v0 = vld [vmem:[#allocation5 + $0x120] sm:$0xf]  ;;  %v1116_v1 = vld [vmem:[#allocation5 + $0x124] sm:$0xf0]  ;;  %v842_v5 = vor.u32 %v1100_v63, %v841_v61  ;;  %v769_v7 = vld [vmem:[#allocation5 + $0x10] sm:$0xf] }
  0x1e   :  { %486 = vmatpush.bf16.msra.mxu1 %v858_v45  ;;  %v969_v2 = vld [vmem:[#allocation5 + $0x1a0] sm:$0xf]  ;;  %v1132_v3 = vld [vmem:[#allocation5 + $0x1a4] sm:$0xf0]  ;;  %v906_v6 = vor.u32 %v1116_v1, %v905_v0  ;;  %v1082_v8 = vld [vmem:[#allocation5 + $0x14] sm:$0xf0] }
  0x1f   :  { %499 = vmatpush.bf16.msra.mxu2 %v922_v46  ;;  %v833_v9 = vld [vmem:[#allocation5 + $0x90] sm:$0xf]  ;;  %v970_v10 = vor.u32 %v1132_v3, %v969_v2  ;;  %v1098_v11 = vld [vmem:[#allocation5 + $0x94] sm:$0xf0]  ;;  %v770_v16 = vor.u32 %v1082_v8, %v769_v7  ;;  %v761_v17 = vld [vmem:[#allocation5] sm:$0xf] }
  0x20   :  { %512 = vmatpush.bf16.msra.mxu3 %v986_v50  ;;  %v897_v12 = vld [vmem:[#allocation5 + $0x110] sm:$0xf]  ;;  %v1114_v13 = vld [vmem:[#allocation5 + $0x114] sm:$0xf0]  ;;  %v1080_v18 = vld [vmem:[#allocation5 + $0x4] sm:$0xf0]  ;;  %v834_v19 = vor.u32 %v1098_v11, %v833_v9 }
  0x21   :  { %474 = vmatpush.bf16.msra.mxu0 %v786_v56  ;;  %v961_v14 = vld [vmem:[#allocation5 + $0x190] sm:$0xf]  ;;  %v1130_v15 = vld [vmem:[#allocation5 + $0x194] sm:$0xf0]  ;;  %v898_v20 = vor.u32 %v1114_v13, %v897_v12  ;;  %v825_v21 = vld [vmem:[#allocation5 + $0x80] sm:$0xf]  ;;  %v762_v31 = vor.u32 %v1080_v18, %v761_v17 }
  0x22   :  { %487 = vmatpush.bf16.msra.mxu1 %v850_v57  ;;  %v1096_v22 = vld [vmem:[#allocation5 + $0x84] sm:$0xf0]  ;;  %v889_v23 = vld [vmem:[#allocation5 + $0x100] sm:$0xf]  ;;  %v962_v24 = vor.u32 %v1130_v15, %v961_v14  ;;  %v1093_v28 = vld [vmem:[#allocation5 + $0x74] sm:$0xf] }
  0x23   :  { %500 = vmatpush.bf16.msra.mxu2 %v914_v58  ;;  %v1112_v25 = vld [vmem:[#allocation5 + $0x104] sm:$0xf0]  ;;  %v953_v26 = vld [vmem:[#allocation5 + $0x180] sm:$0xf]  ;;  %v819_v29 = vld [vmem:[#allocation5 + $0x78] sm:$0xf0]  ;;  %v826_v35 = vor.u32 %v1096_v22, %v825_v21 }
  0x24   :  { %513 = vmatpush.bf16.msra.mxu3 %v978_v62  ;;  %v1128_v27 = vld [vmem:[#allocation5 + $0x184] sm:$0xf0]  ;;  %v1109_v30 = vld [vmem:[#allocation5 + $0xf4] sm:$0xf]  ;;  %v883_v32 = vld [vmem:[#allocation5 + $0xf8] sm:$0xf0]  ;;  %v890_v36 = vor.u32 %v1112_v25, %v889_v23  ;;  %v822_v41 = vor.u32 %v1093_v28, %v819_v29 }
  0x25   :  { %475 = vmatpush.bf16.msra.mxu0 %v778_v4  ;;  %v1125_v33 = vld [vmem:[#allocation5 + $0x174] sm:$0xf]  ;;  %v947_v34 = vld [vmem:[#allocation5 + $0x178] sm:$0xf0]  ;;  %v954_v40 = vor.u32 %v1128_v27, %v953_v26  ;;  %v1091_v42 = vld [vmem:[#allocation5 + $0x64] sm:$0xf]  ;;  %v886_v45 = vor.u32 %v1109_v30, %v883_v32 }
  0x26   :  { %488 = vmatpush.bf16.msra.mxu1 %v842_v5  ;;  %v1141_v37 = vld [vmem:[#allocation5 + $0x1f4] sm:$0xf]  ;;  %v1011_v38 = vld [vmem:[#allocation5 + $0x1f8] sm:$0xf0]  ;;  %v72_v43 = vld [vmem:[#allocation3] sm:$0xff]  ;;  %v950_v46 = vor.u32 %v1125_v33, %v947_v34  ;;  %vm751_vm2 = vcmask 7168  }
  0x27   :  { %501 = vmatpush.bf16.msra.mxu2 %v906_v6  ;;  %v74_v39 = vld [vmem:[#allocation3 + $0x10] sm:$0xff]  ;;  %v75_v44 = vld [vmem:[#allocation3 + $0x18] sm:$0xff]  ;;  %v811_v47 = vld [vmem:[#allocation5 + $0x68] sm:$0xf0]  ;;  %v1014_v50 = vor.u32 %v1141_v37, %v1011_v38  ;;  %v1304_v57 = vpack.c.bf16 %v72_v43, %v72_v43 }
  0x28   :  { %514 = vmatpush.bf16.msra.mxu3 %v970_v10  ;;  %v1107_v48 = vld [vmem:[#allocation5 + $0xe4] sm:$0xf]  ;;  %v73_v49 = vld [vmem:[#allocation3 + $0x8] sm:$0xff]  ;;  %v1302_v54 = vpack.c.bf16 %v74_v39, %v74_v39  ;;  %v1306_v58 = vpack.c.bf16 %v75_v44, %v75_v44  ;;  %v814_v59 = vor.u32 %v1091_v42, %v811_v47  ;;  %v1089_v63 = vld [vmem:[#allocation5 + $0x54] sm:$0xf] }
  0x29   :  { %476 = vmatpush.bf16.msra.mxu0 %v770_v16  ;;  %v875_v51 = vld [vmem:[#allocation5 + $0xe8] sm:$0xf0]  ;;  %v1123_v52 = vld [vmem:[#allocation5 + $0x164] sm:$0xf]  ;;  %v1308_v60 = vpack.c.bf16 %v73_v49, %v73_v49  ;;  %v803_v0 = vld [vmem:[#allocation5 + $0x58] sm:$0xf0] }
  0x2a   :  { %489 = vmatpush.bf16.msra.mxu1 %v834_v19  ;;  %v939_v53 = vld [vmem:[#allocation5 + $0x168] sm:$0xf0]  ;;  %v1139_v55 = vld [vmem:[#allocation5 + $0x1e4] sm:$0xf]  ;;  %v878_v61 = vor.u32 %v1107_v48, %v875_v51  ;;  %v1105_v1 = vld [vmem:[#allocation5 + $0xd4] sm:$0xf]  ;;  %v806_v8 = vor.u32 %v1089_v63, %v803_v0 }
  0x2b   :  { %502 = vmatpush.bf16.msra.mxu2 %v898_v20  ;;  %v1003_v56 = vld [vmem:[#allocation5 + $0x1e8] sm:$0xf0]  ;;  %v942_v62 = vor.u32 %v1123_v52, %v939_v53  ;;  %v867_v3 = vld [vmem:[#allocation5 + $0xd8] sm:$0xf0]  ;;  %v1121_v4 = vld [vmem:[#allocation5 + $0x154] sm:$0xf] }
  0x2c   :  { %515 = vmatpush.bf16.msra.mxu3 %v962_v24  ;;  %v1006_v2 = vor.u32 %v1139_v55, %v1003_v56  ;;  %v931_v5 = vld [vmem:[#allocation5 + $0x158] sm:$0xf0]  ;;  %v1137_v6 = vld [vmem:[#allocation5 + $0x1d4] sm:$0xf]  ;;  %v870_v9 = vor.u32 %v1105_v1, %v867_v3  ;;  %v1087_v11 = vld [vmem:[#allocation5 + $0x44] sm:$0xf] }
  0x2d   :  { %477 = vmatpush.bf16.msra.mxu0 %v762_v31  ;;  %v995_v7 = vld [vmem:[#allocation5 + $0x1d8] sm:$0xf0]  ;;  %v934_v10 = vor.u32 %v1121_v4, %v931_v5  ;;  %v795_v12 = vld [vmem:[#allocation5 + $0x48] sm:$0xf0]  ;;  %v1103_v13 = vld [vmem:[#allocation5 + $0xc4] sm:$0xf] }
  0x2e   :  { %490 = vmatpush.bf16.msra.mxu1 %v826_v35  ;;  %v998_v14 = vor.u32 %v1137_v6, %v995_v7  ;;  %v859_v15 = vld [vmem:[#allocation5 + $0xc8] sm:$0xf0]  ;;  %v1119_v16 = vld [vmem:[#allocation5 + $0x144] sm:$0xf]  ;;  %v798_v20 = vor.u32 %v1087_v11, %v795_v12  ;;  %v1085_v23 = vld [vmem:[#allocation5 + $0x34] sm:$0xf] }
  0x2f   :  { %503 = vmatpush.bf16.msra.mxu2 %v890_v36  ;;  %v923_v17 = vld [vmem:[#allocation5 + $0x148] sm:$0xf0]  ;;  %v1135_v18 = vld [vmem:[#allocation5 + $0x1c4] sm:$0xf]  ;;  %v862_v21 = vor.u32 %v1103_v13, %v859_v15  ;;  %v787_v24 = vld [vmem:[#allocation5 + $0x38] sm:$0xf0] }
  0x30   :  { %516 = vmatpush.bf16.msra.mxu3 %v954_v40  ;;  %478 = vmatmul.bf16.vlgmr.msra.gmra.mxu0 %v1304_v57  ;;  %v987_v19 = vld [vmem:[#allocation5 + $0x1c8] sm:$0xf0]  ;;  %v926_v22 = vor.u32 %v1119_v16, %v923_v17  ;;  %v1101_v25 = vld [vmem:[#allocation5 + $0xb4] sm:$0xf]  ;;  %v851_v27 = vld [vmem:[#allocation5 + $0xb8] sm:$0xf0]  ;;  %v790_v32 = vor.u32 %v1085_v23, %v787_v24 }
  0x31   :  { %522 = vmatpush.bf16.msrb.mxu0 %v822_v41  ;;  %491 = vmatmul.bf16.vlgmr.msra.gmra.mxu1 %v1308_v60  ;;  %v990_v26 = vor.u32 %v1135_v18, %v987_v19  ;;  %v1117_v28 = vld [vmem:[#allocation5 + $0x134] sm:$0xf]  ;;  %v915_v29 = vld [vmem:[#allocation5 + $0x138] sm:$0xf0]  ;;  %v1083_v33 = vld [vmem:[#allocation5 + $0x24] sm:$0xf]  ;;  %v854_v34 = vor.u32 %v1101_v25, %v851_v27 }
  0x32   :  { %535 = vmatpush.bf16.msrb.mxu1 %v886_v45  ;;  %504 = vmatmul.bf16.vlgmr.msra.gmra.mxu2 %v1302_v54  ;;  %v1133_v30 = vld [vmem:[#allocation5 + $0x1b4] sm:$0xf]  ;;  %v979_v31 = vld [vmem:[#allocation5 + $0x1b8] sm:$0xf0]  ;;  %v918_v35 = vor.u32 %v1117_v28, %v915_v29  ;;  %v779_v36 = vld [vmem:[#allocation5 + $0x28] sm:$0xf0] }
  0x33   :  { %548 = vmatpush.bf16.msrb.mxu2 %v950_v46  ;;  %517 = vmatmul.bf16.vlgmr.msra.gmra.mxu3 %v1306_v58  ;;  %v1099_v37 = vld [vmem:[#allocation5 + $0xa4] sm:$0xf]  ;;  %v982_v38 = vor.u32 %v1133_v30, %v979_v31  ;;  %v843_v39 = vld [vmem:[#allocation5 + $0xa8] sm:$0xf0]  ;;  %v782_v44 = vor.u32 %v1083_v33, %v779_v36  ;;  %v1081_v47 = vld [vmem:[#allocation5 + $0x14] sm:$0xf] }
  0x34   :  { %561 = vmatpush.bf16.msrb.mxu3 %v1014_v50  ;;  %v1115_v40 = vld [vmem:[#allocation5 + $0x124] sm:$0xf]  ;;  %v907_v41 = vld [vmem:[#allocation5 + $0x128] sm:$0xf0]  ;;  %v846_v45 = vor.u32 %v1099_v37, %v843_v39  ;;  %v771_v48 = vld [vmem:[#allocation5 + $0x18] sm:$0xf0] }
  0x35   :  { %523 = vmatpush.bf16.msrb.mxu0 %v814_v59  ;;  %v1131_v42 = vld [vmem:[#allocation5 + $0x1a4] sm:$0xf]  ;;  %v971_v43 = vld [vmem:[#allocation5 + $0x1a8] sm:$0xf0]  ;;  %v910_v46 = vor.u32 %v1115_v40, %v907_v41  ;;  %v1097_v49 = vld [vmem:[#allocation5 + $0x94] sm:$0xf]  ;;  %v774_v59 = vor.u32 %v1081_v47, %v771_v48 }
  0x36   :  { %536 = vmatpush.bf16.msrb.mxu1 %v878_v61  ;;  %v974_v50 = vor.u32 %v1131_v42, %v971_v43  ;;  %v835_v51 = vld [vmem:[#allocation5 + $0x98] sm:$0xf0]  ;;  %v1113_v52 = vld [vmem:[#allocation5 + $0x114] sm:$0xf]  ;;  %v1079_v63 = vld [vmem:[#allocation5 + $0x4] sm:$0xf] }
  0x37   :  { %549 = vmatpush.bf16.msrb.mxu2 %v942_v62  ;;  %v899_v53 = vld [vmem:[#allocation5 + $0x118] sm:$0xf0]  ;;  %v1129_v55 = vld [vmem:[#allocation5 + $0x194] sm:$0xf]  ;;  %v838_v61 = vor.u32 %v1097_v49, %v835_v51  ;;  %v763_v0 = vld [vmem:[#allocation5 + $0x8] sm:$0xf0] }
  0x38   :  { %562 = vmatpush.bf16.msrb.mxu3 %v1006_v2  ;;  %v963_v56 = vld [vmem:[#allocation5 + $0x198] sm:$0xf0]  ;;  %v902_v62 = vor.u32 %v1113_v52, %v899_v53  ;;  %v1095_v1 = vld [vmem:[#allocation5 + $0x84] sm:$0xf]  ;;  %v827_v3 = vld [vmem:[#allocation5 + $0x88] sm:$0xf0] }
  0x39   :  { %524 = vmatpush.bf16.msrb.mxu0 %v806_v8  ;;  %v966_v2 = vor.u32 %v1129_v55, %v963_v56  ;;  %v1111_v4 = vld [vmem:[#allocation5 + $0x104] sm:$0xf]  ;;  %v891_v5 = vld [vmem:[#allocation5 + $0x108] sm:$0xf0]  ;;  %v766_v8 = vor.u32 %v1079_v63, %v763_v0  ;;  %v1150_v12 = vld [vmem:[#allocation7 + $0x38] sm:$0xff] }
  0x3a   :  { %537 = vmatpush.bf16.msrb.mxu1 %v870_v9  ;;  %v1127_v6 = vld [vmem:[#allocation5 + $0x184] sm:$0xf]  ;;  %v955_v7 = vld [vmem:[#allocation5 + $0x188] sm:$0xf0]  ;;  %v830_v9 = vor.u32 %v1095_v1, %v827_v3  ;;  %v1149_v13 = vld [vmem:[#allocation7 + $0x30] sm:$0xff] }
  0x3b   :  { %550 = vmatpush.bf16.msrb.mxu2 %v934_v10  ;;  %v894_v10 = vor.u32 %v1111_v4, %v891_v5  ;;  %v958_v11 = vor.u32 %v1127_v6, %v955_v7  ;;  %v1147_v15 = vld [vmem:[#allocation7 + $0x20] sm:$0xff]  ;;  %v1146_v16 = vld [vmem:[#allocation7 + $0x18] sm:$0xff]  ;;  %v1145_v17 = vld [vmem:[#allocation7 + $0x10] sm:$0xff]  ;;  %v749_v7 = vstv %s1339_s6 }
  0x3c   :  { %563 = vmatpush.bf16.msrb.mxu3 %v998_v14  ;;  %v1148_v14 = vld [vmem:[#allocation7 + $0x28] sm:$0xff]  ;;  %v1158_v19 = vld [vmem:[#allocation7 + $0x78] sm:$0xff]  ;;  %v1153_v23 = vld [vmem:[#allocation7 + $0x50] sm:$0xff] }
  0x3d   :  { %525 = vmatpush.bf16.msrb.mxu0 %v798_v20  ;;  %v1144_v18 = vld [vmem:[#allocation7 + $0x8] sm:$0xff]  ;;  %v1143_v20 = vld [vmem:[#allocation7] sm:$0xff] }
  0x3e   :  { %538 = vmatpush.bf16.msrb.mxu1 %v862_v21  ;;  %v1152_v29 = vld [vmem:[#allocation7 + $0x48] sm:$0xff]  ;;  %v1166_v63 = vld [vmem:[%s1337_s4] ss:$0 sm:$0xff] }
  0x3f   :  { %551 = vmatpush.bf16.msrb.mxu2 %v926_v22  ;;  %v1154_v22 = vld [vmem:[#allocation7 + $0x58] sm:$0xff]  ;;  %v1167_v3 = vld [vmem:[%s1338_s5] ss:$0 sm:$0xff] }
  0x40   :  { %564 = vmatpush.bf16.msrb.mxu3 %v990_v26 }
  0x41   :  { %526 = vmatpush.bf16.msrb.mxu0 %v790_v32 }
  0x42   :  { %539 = vmatpush.bf16.msrb.mxu1 %v854_v34 }
  0x43   :  { %552 = vmatpush.bf16.msrb.mxu2 %v918_v35  ;;  %v1151_v35 = vld [vmem:[#allocation7 + $0x40] sm:$0xff] }
  0x44   :  { %565 = vmatpush.bf16.msrb.mxu3 %v982_v38 }
  0x45   :  { %527 = vmatpush.bf16.msrb.mxu0 %v782_v44 }
  0x46   :  { %540 = vmatpush.bf16.msrb.mxu1 %v846_v45 }
  0x47   :  { %553 = vmatpush.bf16.msrb.mxu2 %v910_v46 }
  0x48   :  { %566 = vmatpush.bf16.msrb.mxu3 %v974_v50 }
  0x49   :  { %528 = vmatpush.bf16.msrb.mxu0 %v774_v59 }
  0x4a   :  { %541 = vmatpush.bf16.msrb.mxu1 %v838_v61 }
  0x4b   :  { %554 = vmatpush.bf16.msrb.mxu2 %v902_v62 }
  0x4c   :  { %567 = vmatpush.bf16.msrb.mxu3 %v966_v2 }
  0x4d   :  { %529 = vmatpush.bf16.msrb.mxu0 %v766_v8 }
  0x4e   :  { %542 = vmatpush.bf16.msrb.mxu1 %v830_v9 }
  0x4f   :  { %555 = vmatpush.bf16.msrb.mxu2 %v894_v10 }
  0x50   :  { %568 = vmatpush.bf16.msrb.mxu3 %v958_v11  ;;  %530 = vmatmul.bf16.vlgmr.msrb.gmra.mxu0 %v1304_v57  ;;  %v1157_v57 = vld [vmem:[#allocation7 + $0x70] sm:$0xff] }
  0x51   :  { %714 = vmatpush.bf16.msra.mxu0 %v1150_v12  ;;  %543 = vmatmul.bf16.vlgmr.msrb.gmra.mxu1 %v1308_v60  ;;  %v144_v60 = vld [vmem:[%s1335_s2] sm:$0x3] }
  0x52   :  { %556 = vmatmul.bf16.vlgmr.msrb.gmra.mxu2 %v1302_v54  ;;  %727 = vmatpush.bf16.msra.mxu1 %v1158_v19  ;;  %v1156_v54 = vld [vmem:[#allocation7 + $0x68] sm:$0xff]  ;;  %v146_v21 = vperm.slane %v144_v60, 0  ;;  %v147_v41 = vperm.slane %v144_v60, 1 }
  0x53   :  { %569 = vmatmul.bf16.vlgmr.msrb.gmra.mxu3 %v1306_v58  ;;  %v1155_v58 = vld [vmem:[#allocation7 + $0x60] sm:$0xff] }
  0x55   :  { %715 = vmatpush.bf16.msra.mxu0 %v1149_v13 }
  0x56   :  { %728 = vmatpush.bf16.msra.mxu1 %v1157_v57 }
  0x59   :  { %716 = vmatpush.bf16.msra.mxu0 %v1148_v14 }
  0x5a   :  { %729 = vmatpush.bf16.msra.mxu1 %v1156_v54 }
  0x5d   :  { %717 = vmatpush.bf16.msra.mxu0 %v1147_v15 }
  0x5e   :  { %730 = vmatpush.bf16.msra.mxu1 %v1155_v58 }
  0x61   :  { %718 = vmatpush.bf16.msra.mxu0 %v1146_v16 }
  0x62   :  { %731 = vmatpush.bf16.msra.mxu1 %v1154_v22 }
  0x65   :  { %719 = vmatpush.bf16.msra.mxu0 %v1145_v17 }
  0x66   :  { %732 = vmatpush.bf16.msra.mxu1 %v1153_v23 }
  0x69   :  { %720 = vmatpush.bf16.msra.mxu0 %v1144_v18 }
  0x6a   :  { %733 = vmatpush.bf16.msra.mxu1 %v1152_v29 }
  0x6d   :  { %721 = vmatpush.bf16.msra.mxu0 %v1143_v20 }
  0x6e   :  { %734 = vmatpush.bf16.msra.mxu1 %v1151_v35 }
  0xad   :  { %v479_v24 = vpop.f32.mrf.mxu0 }
  0xae   :  { %v480_v25 = vadd.f32 %v479_v24, %v146_v21  ;;  %v492_v26 = vpop.f32.mrf.mxu1 }
  0xb0   :  { %v493_v27 = vadd.f32 %v492_v26, %v480_v25 }
  0xb5   :  { %v505_v28 = vpop.f32.mrf.mxu2  ;;  %v481_v33 = vpop.f32.mrf.mxu0 }
  0xb6   :  { %v506_v30 = vadd.f32 %v505_v28, %v493_v27  ;;  %v518_v31 = vpop.f32.mrf.mxu3  ;;  %v494_v34 = vpop.f32.mrf.mxu1 }
  0xb8   :  { %v519_v32 = vadd.f32 %v518_v31, %v506_v30 }
  0xba   :  { %vm574_vm0 = vcmp.gt.f32.partialorder %v519_v32, 0.0  ;;  %v576_v36 = vmul.f32 0.1, %v519_v32 }
  0xbc   :  { %v578_v37 = vsel %vm574_vm0, %v519_v32, %v576_v36 }
  0xbd   :  { %v580_v38 = vpack.c.bf16 %v578_v37, %v578_v37  ;;  %v507_v39 = vpop.f32.mrf.mxu2 }
  0xbe   :  { %v520_v40 = vpop.f32.mrf.mxu3 }
  0xbf   :  { %722 = vmatmul.bf16.vlgmr.msra.gmra.mxu0 %v580_v38 }
  0xcd   :  { %v531_v42 = vpop.f32.mrf.mxu0 }
  0xce   :  { %v532_v43 = vadd.f32 %v531_v42, %v147_v41  ;;  %v544_v44 = vpop.f32.mrf.mxu1 }
  0xd0   :  { %v545_v45 = vadd.f32 %v544_v44, %v532_v43 }
  0xd5   :  { %v557_v46 = vpop.f32.mrf.mxu2  ;;  %v533_v49 = vpop.f32.mrf.mxu0 }
  0xd6   :  { %v558_v47 = vadd.f32 %v557_v46, %v545_v45  ;;  %v570_v48 = vpop.f32.mrf.mxu3  ;;  %v546_v50 = vpop.f32.mrf.mxu1 }
  0xd8   :  { %v571_v51 = vadd.f32 %v570_v48, %v558_v47 }
  0xda   :  { %vm575_vm1 = vcmp.gt.f32.partialorder %v571_v51, 0.0  ;;  %v577_v52 = vmul.f32 0.1, %v571_v51 }
  0xdc   :  { %v579_v53 = vsel %vm575_vm1, %v571_v51, %v577_v52 }
  0xdd   :  { %v581_v55 = vpack.c.bf16 %v579_v53, %v579_v53  ;;  %v559_v56 = vpop.f32.mrf.mxu2 }
  0xde   :  { %v572_v59 = vpop.f32.mrf.mxu3 }
  0xdf   :  { %735 = vmatmul.bf16.vlgmr.msra.gmra.mxu1 %v581_v55 }
 0x13c   :  { %v723_v61 = vpop.f32.mrf.mxu0 }
 0x13d   :  { %v724_v0 = vadd.f32 %v1166_v63, %v723_v61 }
 0x144   :  { %v725_v62 = vpop.f32.mrf.mxu0 }
 0x15c   :  { %v736_v1 = vpop.f32.mrf.mxu1 }
 0x15d   :  { %v737_v2 = vadd.f32 %v736_v1, %v724_v0 }
 0x15f   :  { %1168 = vtanh.f32 %v737_v2 }
 0x164   :  { %v738_v4 = vpop.f32.mrf.mxu1 }
 0x165   :  { %v1169_v5 = vpop.eup %1168 }
 0x166   :  { %v745_v6 = vmul.f32 %v1169_v5, %v1167_v3 }
 0x168   :  { %746 = vadd.xlane.f32.xlu0 %v745_v6 }
 0x1db   :  { %v747_v8 = vpop.xlane.xlu0 %746 }
 0x1dc   :  { %v750_v9 = vadd.f32 %v749_v7, %v747_v8 }
 0x1de   :  { %752 = vst.msk [vmem:[%s1340_s7] sm:$0xff] %vm751_vm2, %v750_v9 }
 0x1df   :  { %757 = vsyncpa [#allocation4], 1 }
 0x1e0   :  { %758 = vsyncpa [#allocation6], 1 }

</bundles_post_ra>
